<compile_context>
chip_gen: v7x
topology: tpu7x:2x2x1
jax: 0.10.0
libtpu: 0.0.40
codegen_flags: <defaults>
</compile_context>

<pallas_src>
import functools

import jax
import jax.numpy as jnp
import numpy as np
from jax import lax
from jax.experimental import pallas as pl
from jax.experimental.pallas import tpu as pltpu

REG_COEF = 0.01          # regularization_coef
_NUM_CORE_SPLITS = 2     # leading "parallel" grid axis (v7x megacore); harmless on 1-TC chips


def _round_up(x, m):
    return ((x + m - 1) // m) * m


def _vmem_capacity_bytes(default_bytes=64 << 20):
    """Generation-aware VMEM capacity; conservative 64 MiB (v7x) fallback."""
    try:
        cap = int(getattr(pltpu.get_tpu_info(), "vmem_capacity_bytes", 0))
        return cap if cap > 0 else default_bytes
    except Exception:
        return default_bytes


def _tau_loss_kernel(lamb_ref, bias_ref, yphi_ref, loss_ref, *,
                     d_total, tiles_per_core, n_chunk):
    """One (core, doc-tile) step: accumulate
       sum_{valid docs, K} ( (sum_N yphi) * log_softmax_K(lamb + bias) )."""
    @pl.when(pl.program_id(1) == 0)
    def _init():
        loss_ref[...] = jnp.zeros_like(loss_ref)

    t_d, n_tok, _k = yphi_ref.shape

    # ---- log(theta) = stable log-softmax over topics K (lane axis) ----
    logits = lamb_ref[...].astype(jnp.float32) + bias_ref[...]              # (t_d, K)
    m = jnp.max(logits, axis=-1, keepdims=True)
    z = logits - m
    log_theta = z - jnp.log(jnp.sum(jnp.exp(z), axis=-1, keepdims=True))

    # ---- sum over tokens N in sublane-aligned chunks, accumulating in f32 ----
    # (avoids a full (t_d, N, K) f32 cast temp in VMEM)
    ysum = None
    for n0 in range(0, n_tok, n_chunk):
        n1 = min(n0 + n_chunk, n_tok)
        part = jnp.sum(yphi_ref[:, n0:n1, :].astype(jnp.float32), axis=1)   # (t_d, K)
        ysum = part if ysum is None else ysum + part

    # ---- mask ragged / duplicated rows of this tile (no wrapper padding of yphi) ----
    tile_id = pl.program_id(0) * tiles_per_core + pl.program_id(1)
    row_ids = tile_id * t_d + lax.broadcasted_iota(jnp.int32, (t_d, 1), 0)  # (t_d, 1)
    valid = row_ids < d_total
    contrib = jnp.where(valid, ysum * log_theta, 0.0)                       # (t_d, K)

    # per-core resident (1,1,1) accumulator; full reduce is hidden under the DMA-bound step
    loss_ref[...] += jnp.sum(contrib)


def tau_opt_forward(lamb, yphi, tc_t, tc_r, tc_e, tc_n, tc_c,
                    regularization_coef=REG_COEF, tile_d=None):
    """lamb: (K, D) as in PyTorch (`lamb[:, idx]` slices docs); yphi: (D, N, K); tc_*: (1, K)."""
    K, D = lamb.shape
    Dy, N, Ky = yphi.shape
    assert Dy == D and Ky == K, (lamb.shape, yphi.shape)

    # glue (tiny vs yphi traffic): docs-major lamb in f32, pre-summed per-topic bias.
    lamb_dk = jnp.transpose(lamb).astype(jnp.float32)                       # (D, K)
    bias = (tc_t + tc_r + tc_e + tc_n + tc_c).astype(jnp.float32).reshape(1, K)

    # ---- tile sizing with REAL layout padding (lanes -> 128, sublanes -> dtype multiple) ----
    itemsize = jnp.dtype(yphi.dtype).itemsize
    k_pad = _round_up(K, 128)
    sub = max(8, 32 // max(itemsize, 1))        # f32 -> 8, bf16 -> 16, int8/fp8 -> 32
    n_pad = _round_up(N, sub)
    n_chunk = int(min(N, sub))                  # N-chunk for the in-kernel f32 partial sums

    yphi_doc = n_pad * k_pad * itemsize         # padded VMEM bytes of one doc's yphi slice
    lamb_doc = k_pad * 4
    f32_row = k_pad * 4                         # logits / log_theta / ysum / contrib rows
    chunk_doc = n_chunk * k_pad * 4             # f32 chunk cast temp
    per_doc = 2 * yphi_doc + 2 * lamb_doc + chunk_doc + 5 * f32_row   # 2x = double-buffered

    vmem_cap = _vmem_capacity_bytes()
    budget = int(0.55 * vmem_cap)               # tiles + temps share ~55% of physical VMEM

    if tile_d is None:
        t_d = (budget // per_doc) // 8 * 8
    else:
        t_d = _round_up(int(tile_d), 8)
    t_d = int(max(8, min(t_d, _round_up(D, 8))))

    num_d_tiles = (D + t_d - 1) // t_d
    tiles_per_core = (num_d_tiles + _NUM_CORE_SPLITS - 1) // _NUM_CORE_SPLITS
    last_block = num_d_tiles - 1

    needed = t_d * per_doc + (4 << 20)
    vmem_limit = int(min(max(int(1.25 * needed), 32 << 20), int(0.9 * vmem_cap)))

    # clamp block indices so the DMA window never starts out of bounds; the clamped
    # (duplicated) tiles on the second core are fully masked by `row_ids < D` in-kernel.
    def _lamb_map(c, i):
        return (jnp.minimum(c * tiles_per_core + i, last_block), 0)

    def _yphi_map(c, i):
        return (jnp.minimum(c * tiles_per_core + i, last_block), 0, 0)

    kernel = functools.partial(
        _tau_loss_kernel, d_total=D, tiles_per_core=tiles_per_core, n_chunk=n_chunk)

    cost = pl.CostEstimate(
        flops=int(2 * D * N * K + 8 * D * K),
        transcendentals=int(2 * D * K),
        bytes_accessed=int(D * N * K * itemsize + D * K * 4 + K * 4),
    )

    loss_parts = pl.pallas_call(
        kernel,
        out_shape=jax.ShapeDtypeStruct((_NUM_CORE_SPLITS, 1, 1), jnp.float32),
        grid=(_NUM_CORE_SPLITS, tiles_per_core),
        in_specs=[
            pl.BlockSpec((t_d, K), _lamb_map),            # lamb tile (f32)
            pl.BlockSpec((1, K), lambda c, i: (0, 0)),    # bias (resident)
            pl.BlockSpec((t_d, N, K), _yphi_map),         # yphi tile (native dtype, streamed)
        ],
        out_specs=pl.BlockSpec((1, 1, 1), lambda c, i: (c, 0, 0)),   # per-core accumulator
        compiler_params=pltpu.CompilerParams(
            dimension_semantics=("parallel", "arbitrary"),
            vmem_limit_bytes=vmem_limit,
        ),
        cost_estimate=cost,
    )(lamb_dk, bias, yphi)

    # final normalization with the ORIGINAL sizes: mean over N tokens, then mean over (D, K).
    loss = -jnp.sum(loss_parts) / jnp.float32(N * D * K)

    # regularizer: O(5K) work, plain JAX off the streaming hot path.
    reg = regularization_coef * (
        jnp.mean(jnp.abs(tc_t)) + jnp.mean(jnp.abs(tc_r)) + jnp.mean(jnp.abs(tc_e))
        + jnp.mean(jnp.abs(tc_n)) + jnp.mean(jnp.abs(tc_c)))
    return loss, reg.astype(jnp.float32)


if __name__ == "__main__":
    # Small deterministic problem: D=20 docs (ragged vs tile_d=8), N=16 tokens, K=32 topics.
    D, N, K = 20, 16, 32
    key = jax.random.PRNGKey(0)
    k_lamb, k_yphi, kt, kr, ke, kn, kc = jax.random.split(key, 7)

    lamb = jax.random.normal(k_lamb, (K, D), dtype=jnp.float32)          # (K, D) as in torch
    # yphi: per-token topic responsibilities (rows sum to 1), kept in bf16 (half the HBM bytes)
    yphi = jax.nn.softmax(
        jax.random.normal(k_yphi, (D, N, K), dtype=jnp.float32), axis=-1
    ).astype(jnp.bfloat16)
    tc_t = 0.10 * jax.random.normal(kt, (1, K), dtype=jnp.float32)
    tc_r = 0.10 * jax.random.normal(kr, (1, K), dtype=jnp.float32)
    tc_e = 0.10 * jax.random.normal(ke, (1, K), dtype=jnp.float32)
    tc_n = 0.10 * jax.random.normal(kn, (1, K), dtype=jnp.float32)
    tc_c = 0.10 * jax.random.normal(kc, (1, K), dtype=jnp.float32)

    # tile_d=8 -> 3 real doc tiles over a (2, 2) grid: exercises the ragged-tail mask,
    # the clamped+fully-masked duplicate tile, and the per-core accumulator path.
    loss, reg = tau_opt_forward(lamb, yphi, tc_t, tc_r, tc_e, tc_n, tc_c, tile_d=8)
    jax.block_until_ready((loss, reg))

    # Pure-JAX reference (same assumed topic_prev_dist) for a correctness sanity check.
    yphi_f32 = yphi.astype(jnp.float32)
    logits_ref = lamb.T + (tc_t + tc_r + tc_e + tc_n + tc_c)
    log_theta_ref = jax.nn.log_softmax(logits_ref, axis=-1)
    loss_ref = -jnp.mean(jnp.mean(yphi_f32, axis=1) * log_theta_ref)
    reg_ref = REG_COEF * (jnp.mean(jnp.abs(tc_t)) + jnp.mean(jnp.abs(tc_r))
                          + jnp.mean(jnp.abs(tc_e)) + jnp.mean(jnp.abs(tc_n))
                          + jnp.mean(jnp.abs(tc_c)))
    np.testing.assert_allclose(np.asarray(loss), np.asarray(loss_ref), rtol=1e-4, atol=1e-6)
    np.testing.assert_allclose(np.asarray(reg), np.asarray(reg_ref), rtol=1e-5, atol=1e-6)

    print("KERNEL_OK")
</pallas_src>

<mosaic_0001>
module attributes {stable_mosaic.version = 11 : i64} {
  func.func @_tau_loss_kernel(%arg0: i32, %arg1: i32, %arg2: memref<8x32xf32, #tpu.memory_space<vmem>>, %arg3: memref<1x32xf32, #tpu.memory_space<vmem>>, %arg4: memref<8x16x32xbf16, #tpu.memory_space<vmem>>, %arg5: memref<1x1x1xf32, #tpu.memory_space<vmem>>) attributes {dimension_semantics = [#tpu.dimension_semantics<parallel>, #tpu.dimension_semantics<arbitrary>], iteration_bounds = array<i64: 2, 2>, scalar_prefetch = 0 : i64, scratch_operands = 0 : i64, tpu.core_type = #tpu.core_type<tc>, window_params = [{transform_indices = @transform_0, window_bounds = array<i64: 8, 32>}, {pipeline_mode = #tpu.pipeline_mode<synchronous>, transform_indices = @transform_1, window_bounds = array<i64: 1, 32>}, {transform_indices = @transform_2, window_bounds = array<i64: 8, 16, 32>}, {transform_indices = @transform_3, window_bounds = array<i64: 1, 1, 1>}]} {
    %c0_i32 = arith.constant 0 : i32
    %0 = arith.cmpi eq, %arg1, %c0_i32 : i32
    %1 = arith.extui %0 : i1 to i32
    %c0_i32_0 = arith.constant 0 : i32
    %2 = arith.cmpi ne, %1, %c0_i32_0 : i32
    scf.if %2 {
      %cst_17 = arith.constant 0.000000e+00 : f32
      %41 = vector.broadcast %cst_17 : f32 to vector<1x1x1xf32>
      %c0_18 = arith.constant 0 : index
      %c0_19 = arith.constant 0 : index
      %c0_20 = arith.constant 0 : index
      %42 = vector.load %arg5[%c0_18, %c0_19, %c0_20] : memref<1x1x1xf32, #tpu.memory_space<vmem>>, vector<1x1x1xf32>
      tpu.vector_store %arg5[%c0_18, %c0_19, %c0_20], %41 {strides = array<i32>} : memref<1x1x1xf32, #tpu.memory_space<vmem>>, vector<1x1x1xf32>,
    } else {
    }
    %c0 = arith.constant 0 : index
    %c0_1 = arith.constant 0 : index
    %3 = vector.load %arg2[%c0, %c0_1] : memref<8x32xf32, #tpu.memory_space<vmem>>, vector<8x32xf32>
    %c0_2 = arith.constant 0 : index
    %c0_3 = arith.constant 0 : index
    %4 = vector.load %arg3[%c0_2, %c0_3] : memref<1x32xf32, #tpu.memory_space<vmem>>, vector<1x32xf32>
    %5 = vector.broadcast %4 : vector<1x32xf32> to vector<8x32xf32>
    %6 = arith.addf %3, %5 : vector<8x32xf32>
    %cst = arith.constant dense<0xFF800000> : vector<8xf32>
    %7 = vector.multi_reduction <maximumf>, %6, %cst [1] : vector<8x32xf32> to vector<8xf32>
    %8 = vector.shape_cast %7 : vector<8xf32> to vector<8x1xf32>
    %9 = vector.broadcast %8 : vector<8x1xf32> to vector<8x32xf32>
    %10 = arith.subf %6, %9 : vector<8x32xf32>
    %11 = math.exp %10 : vector<8x32xf32>
    %cst_4 = arith.constant dense<0.000000e+00> : vector<8xf32>
    %12 = vector.multi_reduction <add>, %11, %cst_4 [1] : vector<8x32xf32> to vector<8xf32>
    %13 = vector.shape_cast %12 : vector<8xf32> to vector<8x1xf32>
    %14 = math.log %13 : vector<8x1xf32>
    %15 = vector.broadcast %14 : vector<8x1xf32> to vector<8x32xf32>
    %16 = arith.subf %10, %15 : vector<8x32xf32>
    %c0_5 = arith.constant 0 : index
    %c0_6 = arith.constant 0 : index
    %c0_7 = arith.constant 0 : index
    %17 = vector.load %arg4[%c0_5, %c0_6, %c0_7] : memref<8x16x32xbf16, #tpu.memory_space<vmem>>, vector<8x16x32xbf16>
    %18 = arith.extf %17 : vector<8x16x32xbf16> to vector<8x16x32xf32>
    %cst_8 = arith.constant dense<0.000000e+00> : vector<8x32xf32>
    %19 = vector.multi_reduction <add>, %18, %cst_8 [1] : vector<8x16x32xf32> to vector<8x32xf32>
    %c2_i32 = arith.constant 2 : i32
    %20 = arith.muli %arg0, %c2_i32 : i32
    %21 = arith.addi %20, %arg1 : i32
    %c8_i32 = arith.constant 8 : i32
    %22 = arith.muli %21, %c8_i32 : i32
    %23 = tpu.iota {dimensions = array<i32: 0>} : vector<8x1xi32>
    %24 = vector.broadcast %22 : i32 to vector<8x1xi32>
    %25 = arith.addi %24, %23 : vector<8x1xi32>
    %c20_i32 = arith.constant 20 : i32
    %26 = vector.broadcast %c20_i32 : i32 to vector<8x1xi32>
    %27 = arith.cmpi slt, %25, %26 : vector<8x1xi32>
    %28 = arith.mulf %19, %16 : vector<8x32xf32>
    %cst_9 = arith.constant 0.000000e+00 : f32
    %29 = vector.shape_cast %27 : vector<8x1xi1> to vector<8x1xi1>
    %30 = vector.broadcast %29 : vector<8x1xi1> to vector<8x32xi1>
    %31 = vector.broadcast %cst_9 : f32 to vector<8x32xf32>
    %32 = arith.select %30, %28, %31 : vector<8x32xi1>, vector<8x32xf32>
    %c0_10 = arith.constant 0 : index
    %c0_11 = arith.constant 0 : index
    %c0_12 = arith.constant 0 : index
    %33 = vector.load %arg5[%c0_10, %c0_11, %c0_12] : memref<1x1x1xf32, #tpu.memory_space<vmem>>, vector<1x1x1xf32>
    %34 = vector.shape_cast %32 : vector<8x32xf32> to vector<1x8x32xf32>
    %cst_13 = arith.constant dense<0.000000e+00> : vector<1xf32>
    %35 = vector.multi_reduction <add>, %34, %cst_13 [1, 2] : vector<1x8x32xf32> to vector<1xf32>
    %36 = vector.shape_cast %35 : vector<1xf32> to vector<1x1x1xf32>
    %37 = vector.extract %36[0, 0, 0] : f32 from vector<1x1x1xf32>
    %38 = vector.broadcast %37 : f32 to vector<1x1x1xf32>
    %39 = arith.addf %33, %38 : vector<1x1x1xf32>
    %c0_14 = arith.constant 0 : index
    %c0_15 = arith.constant 0 : index
    %c0_16 = arith.constant 0 : index
    %40 = vector.load %arg5[%c0_14, %c0_15, %c0_16] : memref<1x1x1xf32, #tpu.memory_space<vmem>>, vector<1x1x1xf32>
    tpu.vector_store %arg5[%c0_14, %c0_15, %c0_16], %39 {strides = array<i32>} : memref<1x1x1xf32, #tpu.memory_space<vmem>>, vector<1x1x1xf32>,
    return
  }
  func.func @transform_0(%arg0: i32, %arg1: i32) -> (i32, i32) {
    %c2_i32 = arith.constant 2 : i32
    %0 = arith.muli %arg0, %c2_i32 : i32
    %1 = arith.addi %0, %arg1 : i32
    %c2_i32_0 = arith.constant 2 : i32
    %2 = arith.minsi %1, %c2_i32_0 : i32
    %c0_i32 = arith.constant 0 : i32
    %c0_i32_1 = arith.constant 0 : i32
    return %2, %c0_i32 : i32, i32
  }
  func.func @transform_1(%arg0: i32, %arg1: i32) -> (i32, i32) {
    %c0_i32 = arith.constant 0 : i32
    %c0_i32_0 = arith.constant 0 : i32
    %c0_i32_1 = arith.constant 0 : i32
    return %c0_i32, %c0_i32_0 : i32, i32
  }
  func.func @transform_2(%arg0: i32, %arg1: i32) -> (i32, i32, i32) {
    %c2_i32 = arith.constant 2 : i32
    %0 = arith.muli %arg0, %c2_i32 : i32
    %1 = arith.addi %0, %arg1 : i32
    %c2_i32_0 = arith.constant 2 : i32
    %2 = arith.minsi %1, %c2_i32_0 : i32
    %c0_i32 = arith.constant 0 : i32
    %c0_i32_1 = arith.constant 0 : i32
    %c0_i32_2 = arith.constant 0 : i32
    return %2, %c0_i32, %c0_i32_1 : i32, i32, i32
  }
  func.func @transform_3(%arg0: i32, %arg1: i32) -> (i32, i32, i32) {
    %c0_i32 = arith.constant 0 : i32
    %c0_i32_0 = arith.constant 0 : i32
    %c0_i32_1 = arith.constant 0 : i32
    return %arg0, %c0_i32, %c0_i32_0 : i32, i32, i32
  }
}

</mosaic_0001>

<bundles_post_ra>
// kernel: tpu_custom_call.1
= control target key start
LH: loop header
LB: loop body
LE: loop exit
PB: predicated region body
PF: predicated region fallthrough
CT: control target
= control target key end

     0   :  { %8 = vsyncpa [#allocation3], 0  ;;  %s1119_s0 = inlined_call_operand.hbm [shape: f32[20,32], index: 0, kind: input, shape index: {}]   ;;  %s1120_s1 = inlined_call_operand.vmem [shape: f32[1,32], index: 1, kind: input, shape index: {}]   ;;  %s1121_s2 = inlined_call_operand.hbm [shape: bf16[20,16,32], index: 2, kind: input, shape index: {}]   ;;  %s1122_s3 = inlined_call_operand.vmem [shape: f32[2,1,1], index: 3, kind: output, shape index: {}]  }
   0x1   :  { %10 = vsyncpa [#allocation3 + $0x1], 0 }
   0x2   :  { %11 = vsyncpa [#allocation5], 0 }
   0x3   :  { %13 = vsyncpa [#allocation5 + $0x1], 0  ;;  %s892_s12 = smov 0   ;;  %s894_s13 = smov 0  }
   0x4   :  { %s896_s14 = smov 0   ;;  %s898_s15 = smov 0  }
   0x5   :  { %s900_s16 = smov 0   ;;  %s902_s17 = smov 0  }
   0x6   :  { %s904_s18 = smov 0   ;;  %s906_s19 = smov 0  }
   0x7 LB: > { %s28_s20 = sadd.s32 1, %s857_s17  ;;  %s31_s21 = sadd.s32 1, %s861_s18  ;;  %s865_s19 = sphi %s906_s19, %s19_s19   ;;  %s861_s18 = sphi %s904_s18, %s1133_s18   ;;  %s857_s17 = sphi %s902_s17, %s1132_s17   ;;  %s853_s16 = sphi %s900_s16, %s1131_s16   ;;  %s849_s15 = sphi %s898_s15, %s1130_s15   ;;  %s845_s14 = sphi %s896_s14, %s1129_s14   ;;  %s841_s13 = sphi %s894_s13, %s1128_s13   ;;  %s837_s12 = sphi %s892_s12, %s1127_s12  }
   0x8   : > { %p29_p0 = scmp.ge.s32.totalorder %s28_s20, 2  ;;  %s588_s22 = sadd.s32 4294967295, %s865_s19  }
   0x9   : > { %s590_s23 = sshll.u32 %s861_s18, 1  ;;  %p53_p1 = scmp.ne.s32.totalorder %s845_s14, %s841_s13 }
   0xa   : > { %s1135_s20 = smov (%p29_p0, %s28_s20), 0  ;;  %s1137_s21 = smov (!%p29_p0, %s31_s21), %s861_s18 }
   0xb   : > { %s36_s24 = sadd.s32 %s857_s17, %s590_s23  ;;  %p33_p2 = scmp.ge.s32.totalorder %s1137_s21, 2 }
   0xc   : > { %p37_p3 = scmp.lt.s32.totalorder %s36_s24, 2  ;;  %p54_p4 = scmp.eq.s32.totalorder %s865_s19, 0 }
   0xd   : > { %p59_p5 = scmp.ne.s32.totalorder %s841_s13, %s837_s12  ;;  %s1139_s21 = smov (%p33_p2, %s1137_s21), 0 }
   0xe   : > { %s1141_s24 = smov (!%p37_p3, %s36_s24), 2  ;;  %s591_s25 = sshll.u32 %s1139_s21, 1 }
   0xf   : > { %p947_p6 = por %p54_p4, %p53_p1  ;;  %s40_s27 = sadd.s32 %s591_s25, %s1135_s20 }
  0x10   : > { %p60_p7 = scmp.eq.s32.totalorder %s588_s22, 0  ;;  %p41_p8 = scmp.lt.s32.totalorder %s40_s27, 2 }
  0x11   : > { %s46_s30 = sadd.s32 1, %s845_s14  ;;  %p595_p11 = scmp.ge.s32.totalorder %s865_s19, 4 }
  0x12   : > { %p952_p9 = por %p60_p7, %p59_p5  ;;  %s1143_s27 = smov (!%p41_p8, %s40_s27), 2 }
  0x13   : > { %s43_s29 = ssub.s32 %s1141_s24, %s1143_s27  ;;  %163 = sbr.rel (%p595_p11) target bundleno = 83 (0x53), region = 20 }
  0x14   : > { %s1125_s28 = scalar_select %p952_p9, 1, 0 }
  0x15   : > { %p44_p10 = scmp.eq.s32.totalorder %s43_s29, 0  ;;  %s963_s5 = sand.u32 (!%p595_p11), 1, %s845_s14  }
  0x16   : > { %s598_s6 = sshll.u32 (!%p595_p11), %s1141_s24, 7  ;;  %s596_s7 = sshll.u32 (!%p595_p11), %s963_s5, 3 }
  0x17   : > { %s959_s4 = scalar_select %p44_p10, %s845_s14, %s46_s30  }
  0x18   : > { %s970_s10 = scalar_lea.hbm (!%p595_p11), %s1119_s0, %s598_s6  ;;  %s171_s11 = scalar_lea.vmem (!%p595_p11), [#allocation2], %s596_s7 }
  0x19   : > { %s182_s12 = sshll.u32 (!%p595_p11), %s171_s11, 4  ;;  %s168_s22 = scalar_lea.sflag (!%p595_p11), [#allocation3], %s963_s5  ;;  %s183_s12 = int_to_ptr.vmem [resolvable:$true] %s182_s12 }
  0x1a   : > { %s739_s23 = scalar_lea.hbm %s970_s10, 128  ;;  %s743_s29 = scalar_lea.hbm %s1119_s0, 384 }
  0x1b   : > { %p740_p12 = scmp.ne.s32.totalorder %s970_s10, %s739_s23  ;;  %p744_p1 = scmp.lt.u32.totalorder %s970_s10, %s1119_s0 }
  0x1c   : > { %p745_p2 = scmp.lt.u32.totalorder %s743_s29, %s739_s23  ;;  %p747_p4 = scmp.lt.u32.totalorder %s739_s23, %s970_s10 }
  0x1d   : > { %p741_p13 = pnand %p740_p12, %p947_p6 }
  0x1e   : > { %p746_p3 = por %p745_p2, %p744_p1 }
  0x1f   : > { %p742_p0 = pneg %p741_p13 }
  0x20   : > { %p748_p5 = por %p747_p4, %p746_p3 }
  0x22   : > { %p749_p7 = pnand %p748_p5, %p742_p0 }
  0x24   : > { %752 = shalt.err (!%p749_p7)
}
  0x25   : > { %s753_s7 = scalar_lea.vmem %s183_s12, 128  ;;  %s867_s8 = smov [#allocation2]  }
  0x26   : > { %p754_p8 = scmp.ne.s32.totalorder %s183_s12, %s753_s7  ;;  %s757_s9 = sshll.u32 %s867_s8, 4  ;;  %s758_s9 = int_to_ptr.vmem [resolvable:$false] %s757_s9 }
  0x27   : > { %s759_s11 = scalar_lea.vmem %s758_s9, 256  ;;  %p760_p12 = scmp.lt.s32.totalorder %s183_s12, %s758_s9 }
  0x28   : > { %p755_p10 = pnand %p754_p8, %p947_p6  ;;  %p761_p13 = scmp.lt.s32.totalorder %s759_s11, %s753_s7 }
  0x2a   : > { %p756_p11 = pneg %p755_p10  ;;  %p762_p9 = por %p761_p13, %p760_p12 }
  0x2c   : > { %p763_p1 = pnand %p762_p9, %p756_p11 }
  0x2e   : > { %766 = shalt.err (!%p763_p1)
}
  0x2f   : > { %665 = dma.hbm_to_vmem [thread:$0]  (%p947_p6), %s970_s10, 128, %s183_s12, %s168_s22  }
  0x30   : > { %188 = sbr.rel (!%p947_p6) target bundleno = 83 (0x53), region = 28  ;;  %s599_s23 = sshll.u32 (%p947_p6), %s963_s5, 6 }
  0x31   : > { %s601_s25 = sshll.u32 (%p947_p6), %s1141_s24, 3  ;;  %s190_s6 = scalar_lea.sflag (%p947_p6), [#allocation5], %s963_s5 }
  0x32   : > { %s199_s27 = ssub.s32 (%p947_p6), 20, %s601_s25  ;;  %s193_s7 = scalar_lea.vmem (%p947_p6), [#allocation4], %s599_s23 }
  0x33   : > { %p200_p0 = scmp.lt.s32.totalorder (%p947_p6), %s199_s27, 8 }
  0x37   : > { %s1145_s27 = smov (!%p200_p0, %s199_s27), 8 }
  0x38   : > { %s994_s29 = sshll.u32 %s1145_s27, 7 }
  0x39   : > { %s205_s30 = ssub.s32 1024, %s994_s29 }
  0x3a   : > { %206 = vsyncadd %s190_s6, %s205_s30  ;;  %p604_p6 = scmp.ne.s32.totalorder %s994_s29, 0  ;;  %s621_s26 = sshll.u32 %s1141_s24, 10 }
  0x3b   : > { %s1005_s22 = scalar_lea.hbm %s1121_s2, %s621_s26  ;;  %s213_s8 = sshll.u32 %s193_s7, 4  ;;  %s1007_s8 = int_to_ptr.vmem [resolvable:$true] %s213_s8 }
  0x3c   : > { %s767_s9 = scalar_lea.hbm %s1005_s22, %s994_s29  ;;  %s771_s24 = scalar_lea.hbm %s1121_s2, 2560 }
  0x3d   : > { %p768_p9 = scmp.ne.s32.totalorder %s1005_s22, %s767_s9  ;;  %p772_p4 = scmp.lt.u32.totalorder %s1005_s22, %s1121_s2 }
  0x3e   : > { %p773_p5 = scmp.lt.u32.totalorder %s771_s24, %s767_s9  ;;  %p775_p8 = scmp.lt.u32.totalorder %s767_s9, %s1005_s22 }
  0x3f   : > { %p769_p2 = pnand %p768_p9, %p604_p6 }
  0x40   : > { %p774_p7 = por %p773_p5, %p772_p4 }
  0x41   : > { %p770_p3 = pneg %p769_p2 }
  0x42   : > { %p776_p10 = por %p775_p8, %p774_p7 }
  0x44   : > { %p777_p11 = pnand %p776_p10, %p770_p3 }
  0x46   : > { %780 = shalt.err (!%p777_p11)
}
  0x47   : > { %s781_s30 = scalar_lea.vmem %s1007_s8, %s994_s29  ;;  %s868_s7 = smov [#allocation4]  }
  0x48   : > { %p782_p12 = scmp.ne.s32.totalorder %s1007_s8, %s781_s30  ;;  %s785_s26 = sshll.u32 %s868_s7, 4  ;;  %s786_s26 = int_to_ptr.vmem [resolvable:$false] %s785_s26 }
  0x49   : > { %s787_s10 = scalar_lea.vmem %s786_s26, 2048  ;;  %p788_p0 = scmp.lt.s32.totalorder %s1007_s8, %s786_s26 }
  0x4a   : > { %p783_p13 = pnand %p782_p12, %p604_p6  ;;  %p789_p9 = scmp.lt.s32.totalorder %s787_s10, %s781_s30 }
  0x4c   : > { %p784_p1 = pneg %p783_p13  ;;  %p790_p2 = por %p789_p9, %p788_p0 }
  0x4e   : > { %p791_p4 = pnand %p790_p2, %p784_p1 }
  0x50   : > { %794 = shalt.err (!%p791_p4)
}
  0x51   : > { %s869_s12 = smov 64   ;;  %s870_s9 = smov 4  }
  0x52   : > { %219 = dma.hbm_to_vmem [thread:$0]  (%p604_p6), %s1005_s22, %s994_s29, %s1007_s8, %s190_s6, %s869_s12, %s869_s12, %s870_s9  }
  0x53 PF: > { %p610_p3 = scmp.ge.s32.totalorder %s865_s19, 1  ;;  %p221_p5 = scmp.lt.s32.totalorder %s865_s19, 5 }
  0x55   : > { %p222_p7 = pnand %p610_p3, %p221_p5 }
  0x56   : > { %s227_s11 = sand.u32 (!%p222_p7), 1, %s841_s13   ;;  %p1126_p8 = scmp.ne.s32.totalorder (!%p222_p7), %s1125_s28, 0 }
  0x57   : > { %225 = sbr.rel (%p222_p7) target bundleno = 651 (0x28b), region = 32  ;;  %s611_s23 = sshll.u32 (!%p222_p7), %s227_s11, 3 }
  0x58   : > { %s228_s24 = scalar_lea.sflag (!%p222_p7), [#allocation3], %s227_s11  ;;  %s231_s25 = scalar_lea.vmem (!%p222_p7), [#allocation2], %s611_s23 }
  0x5e   : > { %828 = dma.done.wait (%p1126_p8), %s228_s24, 128  }
  0x5f   : > { %830 = vsyncadd (%p1126_p8), %s228_s24, 4294967168  ;;  %s612_s5 = sshll.u32 %s227_s11, 6  ;;  %s237_s29 = scalar_lea.sflag [#allocation5], %s227_s11 }
  0x60   : > { %s1042_s6 = scalar_lea.vmem [#allocation4], %s612_s5 }
  0x61   : > { %832 = dma.done.wait (%p1126_p8), %s237_s29, 1024  }
  0x62   : > { %834 = vsyncadd (%p1126_p8), %s237_s29, 4294966272  ;;  %p280_p6 = scmp.lt.s32.totalorder %s853_s16, 1  ;;  %p613_p10 = scmp.ne.s32.totalorder %s849_s15, 0 }
  0x63   : > { %vm287_vm0 = vcmask (!%p613_p10), 0   ;;  %v871_v0 = vmov (!%p613_p10), 0.0  }
  0x64   : > { %s281_s22 = scalar_select %p280_p6, %s853_s16, 1 }
  0x65   : > { %286 = sbr.rel (%p613_p10) target bundleno = 108 (0x6c), region = 44 }
  0x66   : > { %s1053_s30 = scalar_lea.vmem %s1122_s3, %s281_s22 }
  0x67   : > { %288 = vst.msk [vmem:[%s1053_s30] sm:$0x1] (!%p613_p10), %vm287_vm0, %v871_v0 }
  0x6c PF: > { %v289_v1 = vld [vmem:[%s231_s25] sm:$0xff]  ;;  %vm298_vm1 = vcmask 261120   ;;  %v625_v10 = vld [vmem:[%s1042_s6] sm:$0xff]   ;;  %v656_v11 = vld [vmem:[%s1042_s6 + $0x8] sm:$0xff]   ;;  %s615_s26 = sshll.u32 %s853_s16, 1  ;;  %vm458_vm2 = vcmask 1041409  }
  0x6d   : > { %v614_v2 = vld [vmem:[%s1120_s1] ss:$0 sm:$0xff]  ;;  %v658_v13 = vld [vmem:[%s1042_s6 + $0x18] sm:$0xff]   ;;  %v659_v14 = vld [vmem:[%s1042_s6 + $0x20] sm:$0xff]   ;;  %v626_v16 = vunpack.c.l.bf16 %v625_v10  ;;  %v627_v17 = vunpack.c.h.bf16 %v625_v10  ;;  %v630_v18 = vunpack.c.l.bf16 %v656_v11  ;;  %v631_v19 = vunpack.c.h.bf16 %v656_v11  ;;  %s416_s10 = sadd.s32 %s849_s15, %s615_s26 }
  0x6e   : > { %v297_v3 = vadd.f32 %v614_v2, %v289_v1  ;;  %v657_v12 = vld [vmem:[%s1042_s6 + $0x10] sm:$0xff]   ;;  %v660_v15 = vld [vmem:[%s1042_s6 + $0x28] sm:$0xff]   ;;  %v662_v21 = vld [vmem:[%s1042_s6 + $0x38] sm:$0xff]   ;;  %v638_v24 = vunpack.c.l.bf16 %v658_v13  ;;  %v639_v25 = vunpack.c.h.bf16 %v658_v13  ;;  %v642_v26 = vunpack.c.l.bf16 %v659_v14  ;;  %s616_s12 = sshll.u32 %s416_s10, 3 }
  0x6f   : > { %v661_v20 = vld [vmem:[%s1042_s6 + $0x30] sm:$0xff]   ;;  %v634_v22 = vunpack.c.l.bf16 %v657_v12  ;;  %v635_v23 = vunpack.c.h.bf16 %v657_v12  ;;  %v643_v27 = vunpack.c.h.bf16 %v659_v14  ;;  %v646_v28 = vunpack.c.l.bf16 %v660_v15 }
  0x70   : > { %v299_v4 = vsel %vm298_vm1, %v297_v3, -inf  ;;  %v647_v29 = vunpack.c.h.bf16 %v660_v15  ;;  %v650_v30 = vunpack.c.l.bf16 %v661_v20  ;;  %v651_v31 = vunpack.c.h.bf16 %v661_v20 }
  0x71   : > { %300 = vmax.xlane.f32.xlu0 %v299_v4  ;;  %v654_v32 = vunpack.c.l.bf16 %v662_v21  ;;  %v655_v33 = vunpack.c.h.bf16 %v662_v21  ;;  %v343_v34 = vsel %vm298_vm1, %v626_v16, 0.0  ;;  %v344_v35 = vsel %vm298_vm1, %v627_v17, 0.0 }
  0x72   : > { %v352_v36 = vsel %vm298_vm1, %v630_v18, 0.0  ;;  %v353_v37 = vsel %vm298_vm1, %v631_v19, 0.0  ;;  %v361_v38 = vsel %vm298_vm1, %v634_v22, 0.0  ;;  %v362_v39 = vsel %vm298_vm1, %v635_v23, 0.0 }
  0x73   : > { %v370_v40 = vsel %vm298_vm1, %v638_v24, 0.0  ;;  %v371_v41 = vsel %vm298_vm1, %v639_v25, 0.0  ;;  %v379_v42 = vsel %vm298_vm1, %v642_v26, 0.0  ;;  %v380_v43 = vsel %vm298_vm1, %v643_v27, 0.0 }
  0x74   : > { %v388_v44 = vsel %vm298_vm1, %v646_v28, 0.0  ;;  %v389_v45 = vsel %vm298_vm1, %v647_v29, 0.0  ;;  %v345_v46 = vadd.f32 %v344_v35, %v343_v34  ;;  %v354_v47 = vadd.f32 %v353_v37, %v352_v36 }
  0x75   : > { %v363_v48 = vadd.f32 %v362_v39, %v361_v38  ;;  %v372_v49 = vadd.f32 %v371_v41, %v370_v40  ;;  %v397_v50 = vsel %vm298_vm1, %v650_v30, 0.0  ;;  %v398_v51 = vsel %vm298_vm1, %v651_v31, 0.0 }
  0x76   : > { %v406_v52 = vsel %vm298_vm1, %v654_v32, 0.0  ;;  %v407_v53 = vsel %vm298_vm1, %v655_v33, 0.0  ;;  %v381_v54 = vadd.f32 %v380_v43, %v379_v42  ;;  %v390_v55 = vadd.f32 %v389_v45, %v388_v44 }
  0x77   : > { %v346_v56 = vrot.slane %v345_v46, 4  ;;  %v399_v57 = vadd.f32 %v398_v51, %v397_v50  ;;  %v408_v58 = vadd.f32 %v407_v53, %v406_v52  ;;  %v355_v59 = vrot.slane %v354_v47, 4 }
  0x78   : > { %v364_v60 = vrot.slane %v363_v48, 4  ;;  %v373_v61 = vrot.slane %v372_v49, 4  ;;  %v382_v62 = vrot.slane %v381_v54, 4  ;;  %v391_v63 = vrot.slane %v390_v55, 4 }
  0x79   : > { %v347_v0 = vadd.f32 %v346_v56, %v345_v46  ;;  %v400_v1 = vrot.slane %v399_v57, 4  ;;  %v409_v2 = vrot.slane %v408_v58, 4  ;;  %v418_v35 = vlaneseq }
  0x7a   : > { %v365_v4 = vadd.f32 %v364_v60, %v363_v48  ;;  %vm461_vm3 = vcmask 1042434   ;;  %vm464_vm4 = vcmask 1043459   ;;  %vm467_vm5 = vcmask 1044484  }
  0x7b   : > { %v348_v10 = vrot.slane %v347_v0, 2  ;;  %v401_v11 = vadd.f32 %v400_v1, %v399_v57  ;;  %v410_v12 = vadd.f32 %v409_v2, %v408_v58  ;;  %v419_v46 = vshrl.u32 %v418_v35, 7 }
  0x7c   : > { %v366_v14 = vrot.slane %v365_v4, 2  ;;  %vm470_vm6 = vcmask 1045509   ;;  %vm473_vm7 = vcmask 1046534   ;;  %vm476_vm8 = vcmask 1047559  }
  0x7d   : > { %v349_v18 = vadd.f32 %v348_v10, %v347_v0  ;;  %v402_v19 = vrot.slane %v401_v11, 2  ;;  %v411_v20 = vrot.slane %v410_v12, 2  ;;  %vm493_vm10 = vcmask 0  }
  0x7e   : > { %v367_v22 = vadd.f32 %v366_v14, %v365_v4 }
  0x7f   : > { %v350_v26 = vrot.slane %v349_v18, 1  ;;  %v403_v27 = vadd.f32 %v402_v19, %v401_v11  ;;  %v412_v28 = vadd.f32 %v411_v20, %v410_v12 }
  0x80   : > { %v368_v30 = vrot.slane %v367_v22, 1 }
  0x81   : > { %v351_v37 = vadd.f32 %v350_v26, %v349_v18  ;;  %v404_v38 = vrot.slane %v403_v27, 1  ;;  %v413_v39 = vrot.slane %v412_v28, 1 }
  0x82   : > { %v369_v42 = vadd.f32 %v368_v30, %v367_v22 }
  0x83   : > { %v405_v52 = vadd.f32 %v404_v38, %v403_v27  ;;  %v414_v53 = vadd.f32 %v413_v39, %v412_v28 }
  0xfe   : > { %v301_v5 = vpop.xlane.xlu0 %300 }
  0xff   : > { %v1061_v6 = vsub.f32 %v297_v3, %v301_v5  ;;  %v356_v3 = vadd.f32 %v355_v59, %v354_v47  ;;  %v374_v5 = vadd.f32 %v373_v61, %v372_v49  ;;  %v420_v47 = vstv %s616_s12 }
 0x100   : > { %v421_v0 = vadd.s32 %v420_v47, %v419_v46 }
 0x101   : > { %v303_v7 = vmul.f32 1.442695, %v1061_v6  ;;  %v357_v13 = vrot.slane %v356_v3, 2  ;;  %v375_v15 = vrot.slane %v374_v5, 2 }
 0x102   : > { %vm422_vm9 = vcmp.lt.s32.totalorder %v421_v0, 20 }
 0x103   : > { %735 = vpow2.f32 %v303_v7  ;;  %v383_v7 = vadd.f32 %v382_v62, %v381_v54  ;;  %v358_v21 = vadd.f32 %v357_v13, %v356_v3  ;;  %v376_v23 = vadd.f32 %v375_v15, %v374_v5 }
 0x105   : > { %v384_v16 = vrot.slane %v383_v7, 2  ;;  %v359_v29 = vrot.slane %v358_v21, 1  ;;  %v377_v31 = vrot.slane %v376_v23, 1 }
 0x107   : > { %v385_v24 = vadd.f32 %v384_v16, %v383_v7  ;;  %v360_v41 = vadd.f32 %v359_v29, %v358_v21  ;;  %v378_v43 = vadd.f32 %v377_v31, %v376_v23 }
 0x109   : > { %v386_v33 = vrot.slane %v385_v24, 1 }
 0x10b   : > { %v387_v44 = vadd.f32 %v386_v33, %v385_v24 }
 0x10d   : > { %v736_v8 = vpop.eup %735 }
 0x10e   : > { %v305_v9 = vsel %vm298_vm1, %v736_v8, 0.0  ;;  %v392_v8 = vadd.f32 %v391_v63, %v390_v55 }
 0x10f   : > { %306 = vadd.xlane.f32.xlu0 %v305_v9 }
 0x110   : > { %v393_v17 = vrot.slane %v392_v8, 2 }
 0x112   : > { %v394_v25 = vadd.f32 %v393_v17, %v392_v8 }
 0x114   : > { %v395_v34 = vrot.slane %v394_v25, 1 }
 0x116   : > { %v396_v45 = vadd.f32 %v395_v34, %v394_v25  ;;  %v480_v25 = vld [vmem:[%s1053_s30] sm:$0x1] }
 0x19c   : > { %v307_v9 = vpop.xlane.xlu0 %306 }
 0x19d   : > { %737 = vlog2.f32 %v307_v9 }
 0x1a7   : > { %v738_v32 = vpop.eup %737 }
 0x1a8   : > { %v309_v36 = vmul.f32 0.6931472, %v738_v32 }
 0x1aa   : > { %v310_v40 = vsub.f32 %v1061_v6, %v309_v36 }
 0x1ac   : > { %v424_v48 = vrot.slane %v310_v40, 1  ;;  %v425_v49 = vrot.slane %v310_v40, 2  ;;  %v426_v50 = vrot.slane %v310_v40, 3  ;;  %v427_v51 = vrot.slane %v310_v40, 4 }
 0x1ad   : > { %v428_v54 = vrot.slane %v310_v40, 5  ;;  %v429_v55 = vrot.slane %v310_v40, 6  ;;  %v430_v56 = vrot.slane %v310_v40, 7  ;;  %v439_v60 = vmul.f32 %v351_v37, %v310_v40 }
 0x1ae   : > { %v440_v57 = vmul.f32 %v424_v48, %v360_v41  ;;  %v441_v58 = vmul.f32 %v425_v49, %v369_v42  ;;  %v442_v59 = vmul.f32 %v426_v50, %v378_v43  ;;  %v443_v6 = vmul.f32 %v427_v51, %v387_v44 }
 0x1af   : > { %v444_v61 = vmul.f32 %v428_v54, %v396_v45  ;;  %v445_v1 = vmul.f32 %v429_v55, %v405_v52  ;;  %v446_v2 = vmul.f32 %v430_v56, %v414_v53 }
 0x1b0   : > { %v457_v62 = vrot.slane %v440_v57, 7  ;;  %v460_v63 = vrot.slane %v441_v58, 6  ;;  %v463_v4 = vrot.slane %v442_v59, 5  ;;  %v466_v7 = vrot.slane %v443_v6, 4 }
 0x1b1   : > { %v469_v9 = vrot.slane %v444_v61, 3  ;;  %v472_v11 = vrot.slane %v445_v1, 2  ;;  %v475_v13 = vrot.slane %v446_v2, 1 }
 0x1b2   : > { %v459_v3 = vsel %vm458_vm2, %v457_v62, %v439_v60 }
 0x1b3   : > { %v462_v5 = vsel %vm461_vm3, %v460_v63, %v459_v3 }
 0x1b4   : > { %v465_v8 = vsel %vm464_vm4, %v463_v4, %v462_v5 }
 0x1b5   : > { %v468_v10 = vsel %vm467_vm5, %v466_v7, %v465_v8 }
 0x1b6   : > { %v471_v12 = vsel %vm470_vm6, %v469_v9, %v468_v10 }
 0x1b7   : > { %v474_v14 = vsel %vm473_vm7, %v472_v11, %v471_v12 }
 0x1b8   : > { %v477_v15 = vsel %vm476_vm8, %v475_v13, %v474_v14 }
 0x1b9   : > { %v479_v16 = vsel %vm422_vm9, %v477_v15, 0.0 }
 0x1ba   : > { %v481_v17 = vsel %vm298_vm1, %v479_v16, 0.0 }
 0x1bb   : > { %482 = vadd.xlane.f32.xlu1 %v481_v17 }
 0x248   : > { %v483_v18 = vpop.xlane.xlu1 %482 }
 0x249   : > { %v484_v19 = vrot.slane %v483_v18, 4 }
 0x24b   : > { %v485_v20 = vadd.f32 %v484_v19, %v483_v18 }
 0x24d   : > { %v486_v21 = vrot.slane %v485_v20, 2 }
 0x24f   : > { %v487_v22 = vadd.f32 %v486_v21, %v485_v20 }
 0x251   : > { %v488_v23 = vrot.slane %v487_v22, 1 }
 0x253   : > { %v489_v24 = vadd.f32 %v488_v23, %v487_v22 }
 0x255   : > { %663 = vpush %v489_v24 }
 0x286   : > { %s664_s15 = spop %663 }
 0x287   : > { %v491_v26 = vstv %s664_s15 }
 0x288   : > { %v492_v27 = vadd.f32 %v491_v26, %v480_v25 }
 0x28a   : > { %494 = vst.msk [vmem:[%s1053_s30] sm:$0x1] %vm493_vm10, %v492_v27 }
 0x28b PF: > { %s19_s19 = sadd.s32 1, %s865_s19   ;;  %s1127_s12 = smov %s841_s13 }
 0x28c   : > { %p16_p11 = scmp.ge.s32.totalorder %s19_s19, 6   ;;  %s1128_s13 = smov %s845_s14 }
 0x28d   : > { %s1129_s14 = smov %s959_s4  ;;  %s1130_s15 = smov %s857_s17 }
 0x28e   : > { %s1131_s16 = smov %s861_s18  ;;  %s1132_s17 = smov %s1135_s20 }
 0x28f   : > { %s1133_s18 = smov %s1139_s21  ;;  %18 = sbr.rel (!%p16_p11) target bundleno = 7 (0x7), region = 89 }
 0x296   :  { %512 = vsyncpa [#allocation3], 1 }
 0x297   :  { %514 = vsyncpa [#allocation3 + $0x1], 1 }
 0x298   :  { %515 = vsyncpa [#allocation5], 1 }
 0x299   :  { %517 = vsyncpa [#allocation5 + $0x1], 1 }

</bundles_post_ra>
